<compile_context>
chip_gen: v5e
topology: v5e:2x2
jax: 0.10.0
libtpu: 0.0.40
codegen_flags: <defaults>
</compile_context>

<pallas_src>
import functools

import jax
import jax.numpy as jnp
from jax.experimental import pallas as pl
from jax.experimental.pallas import tpu as pltpu


# ----------------------------------------------------------------------------
# Kernel 1: fused input normalization as a per-channel affine  y = x*a + b
#   x2    : (N*C, H*W)  float32, spatial on the lane axis (tiled over lanes)
#   a, b  : (N*C, 1)    float32, per-row (= per (n, c)) scale / shift, resident
#   out   : (N*C, H*W)  bf16 (feeds the bf16 im2col / MXU path)
# ----------------------------------------------------------------------------
def _affine_norm_kernel(x_ref, a_ref, b_ref, o_ref):
    o_ref[...] = (x_ref[...] * a_ref[...] + b_ref[...]).astype(o_ref.dtype)


def input_normalize(x_nchw, mean_c, std_c, *, range_norm, use_input_norm,
                    out_dtype=jnp.bfloat16, lane_block=2048):
    if not range_norm and not use_input_norm:
        return x_nchw.astype(out_dtype)

    N, C, H, W = x_nchw.shape
    # Fold (x+1)/2 and (x-mean)/std into a single affine; reciprocal is computed
    # here in the wrapper (3 scalars) so the kernel is a pure FMA.
    a = jnp.ones((C,), jnp.float32)
    b = jnp.zeros((C,), jnp.float32)
    if range_norm:
        a = a * 0.5
        b = b * 0.5 + 0.5
    if use_input_norm:
        inv_std = 1.0 / std_c.astype(jnp.float32)
        a = a * inv_std
        b = (b - mean_c.astype(jnp.float32)) * inv_std

    R, L = N * C, H * W
    x2 = x_nchw.reshape(R, L).astype(jnp.float32)
    row_a = jnp.tile(a, N).reshape(R, 1)
    row_b = jnp.tile(b, N).reshape(R, 1)

    # Tile the lane (H*W) axis; block is either the full dim or a multiple of 128.
    if L <= lane_block:
        tl = L
    else:
        tl = lane_block  # multiple of 128
    grid_l = pl.cdiv(L, tl)

    out = pl.pallas_call(
        _affine_norm_kernel,
        out_shape=jax.ShapeDtypeStruct((R, L), out_dtype),
        grid=(grid_l,),
        in_specs=[
            pl.BlockSpec((R, tl), lambda j: (0, j)),
            pl.BlockSpec((R, 1), lambda j: (0, 0)),
            pl.BlockSpec((R, 1), lambda j: (0, 0)),
        ],
        out_specs=pl.BlockSpec((R, tl), lambda j: (0, j)),
        compiler_params=pltpu.CompilerParams(
            dimension_semantics=("parallel",),
            vmem_limit_bytes=32 * 1024 * 1024,
        ),
    )(x2, row_a, row_b)
    return out.reshape(N, C, H, W)


# ----------------------------------------------------------------------------
# Kernel 2: conv1 (im2col matmul, bf16 operands, f32 accumulate) with fused
# BatchNorm + ReLU epilogue.  Single lane-dense output:
#   want_conv & want_relu -> (TM, 2*Cout) = [conv1 | relu] on the lane axis
#   otherwise             -> (TM,   Cout) = the single requested hook
# ----------------------------------------------------------------------------
def _conv_bn_relu_kernel(a_ref, w_ref, scale_ref, shift_ref, o_ref, *,
                         want_conv, want_relu):
    acc = jnp.dot(a_ref[...], w_ref[...], preferred_element_type=jnp.float32)
    if want_relu:
        relu = jnp.maximum(acc * scale_ref[...] + shift_ref[...], 0.0)
    if want_conv and want_relu:
        o_ref[...] = jnp.concatenate([acc, relu], axis=-1).astype(o_ref.dtype)
    elif want_conv:
        o_ref[...] = acc.astype(o_ref.dtype)
    else:
        o_ref[...] = relu.astype(o_ref.dtype)


def _im2col_nchw(x, k, stride, pad):
    """im2col for NCHW input (dtype-preserving). Returns (N*Ho*Wo, C*k*k), Ho, Wo.

    Column ordering is (C, ki, kj), matching weight.reshape(Cout, Cin*k*k)."""
    N, C, H, W = x.shape
    xp = jnp.pad(x, ((0, 0), (0, 0), (pad, pad), (pad, pad)))
    Ho = (H + 2 * pad - k) // stride + 1
    Wo = (W + 2 * pad - k) // stride + 1
    patches = []
    for i in range(k):
        for j in range(k):
            patches.append(
                xp[:, :, i : i + stride * Ho : stride, j : j + stride * Wo : stride]
            )
    p = jnp.stack(patches, axis=2)            # (N, C, k*k, Ho, Wo)
    p = p.transpose(0, 3, 4, 1, 2)            # (N, Ho, Wo, C, k*k)
    return p.reshape(N * Ho * Wo, C * k * k), Ho, Wo


def conv1_bn_relu(x_nchw, w_oihw, bn_scale, bn_shift, *, stride=2, pad=3,
                  want_conv=True, want_relu=True, tm_cap=2048):
    assert want_conv or want_relu
    N, C, H, W = x_nchw.shape
    Cout, Cin, k, _ = w_oihw.shape
    assert Cin == C

    # bf16 im2col patches + bf16 weight (halves the dominant HBM traffic of the
    # 12.25x-expanded operand; K is unblocked since 147 is not a multiple of 128).
    a, Ho, Wo = _im2col_nchw(x_nchw.astype(jnp.bfloat16), k, stride, pad)
    M, K = a.shape
    w2 = w_oihw.reshape(Cout, Cin * k * k).T.astype(jnp.bfloat16)   # (K, Cout)
    scale = bn_scale.reshape(1, Cout).astype(jnp.float32)
    shift = bn_shift.reshape(1, Cout).astype(jnp.float32)

    # Tile over M only.  TM=2048 keeps double-buffered a-tiles + output tiles at
    # ~4 MiB, well inside v7x's 32 MiB scoped VMEM (and v5e's default limit).
    tm = M if M <= tm_cap else tm_cap
    grid_m = pl.cdiv(M, tm)
    out_w = Cout * (int(want_conv) + int(want_relu))

    out = pl.pallas_call(
        functools.partial(_conv_bn_relu_kernel,
                          want_conv=want_conv, want_relu=want_relu),
        out_shape=jax.ShapeDtypeStruct((M, out_w), jnp.float32),
        grid=(grid_m,),
        in_specs=[
            pl.BlockSpec((tm, K), lambda i: (i, 0)),      # im2col tile
            pl.BlockSpec((K, Cout), lambda i: (0, 0)),    # weight, resident
            pl.BlockSpec((1, Cout), lambda i: (0, 0)),    # BN scale, resident
            pl.BlockSpec((1, Cout), lambda i: (0, 0)),    # BN shift, resident
        ],
        out_specs=pl.BlockSpec((tm, out_w), lambda i: (i, 0)),
        compiler_params=pltpu.CompilerParams(
            dimension_semantics=("parallel",),
            vmem_limit_bytes=32 * 1024 * 1024,
        ),
    )(a, w2, scale, shift)

    def to_nchw(flat):
        return flat.reshape(N, Ho, Wo, Cout).transpose(0, 3, 1, 2)

    acts = {}
    col = 0
    if want_conv:
        acts["conv1"] = to_nchw(out[:, col:col + Cout])
        col += Cout
    if want_relu:
        acts["relu"] = to_nchw(out[:, col:col + Cout])
    return acts


# ----------------------------------------------------------------------------
# Extractor wrapper (mirrors ResNet50Extractor forward semantics).
# ----------------------------------------------------------------------------
class ResNet50ExtractorPallas:
    IMAGENET_MEAN = jnp.array([0.485, 0.456, 0.406], dtype=jnp.float32)
    IMAGENET_STD = jnp.array([0.229, 0.224, 0.225], dtype=jnp.float32)

    SUPPORTED_HOOKS = ("conv1", "relu")

    def __init__(self, params, layer_labels=("conv1", "relu"),
                 use_input_norm=True, range_norm=False):
        self.params = params
        self.layer_labels = tuple(layer_labels)
        self.use_input_norm = use_input_norm
        self.range_norm = range_norm
        unknown = set(self.layer_labels) - set(self.SUPPORTED_HOOKS)
        if unknown:
            # TODO(synk): hooks into layer1..layer4 bottlenecks not materialized.
            raise NotImplementedError(f"unsupported hooks: {sorted(unknown)}")

    def __call__(self, x_nchw):
        x = input_normalize(
            x_nchw, self.IMAGENET_MEAN, self.IMAGENET_STD,
            range_norm=self.range_norm, use_input_norm=self.use_input_norm,
            out_dtype=jnp.bfloat16,
        )
        eps = 1e-5
        scale = self.params["bn1_gamma"] / jnp.sqrt(self.params["bn1_var"] + eps)
        shift = self.params["bn1_beta"] - self.params["bn1_mean"] * scale
        acts = conv1_bn_relu(
            x, self.params["conv1_w"], scale, shift,
            want_conv=("conv1" in self.layer_labels),
            want_relu=("relu" in self.layer_labels),
        )
        return {label: acts[label] for label in self.layer_labels}


def make_params(key):
    k0, k1, k2, k3, k4 = jax.random.split(key, 5)
    return {
        # ResNet50 stem: Conv2d(3, 64, kernel_size=7, stride=2, padding=3, bias=False)
        "conv1_w": 0.05 * jax.random.normal(k0, (64, 3, 7, 7), jnp.float32),
        "bn1_gamma": 0.5 + jax.random.uniform(k1, (64,), jnp.float32),
        "bn1_beta": 0.1 * jax.random.normal(k2, (64,), jnp.float32),
        "bn1_mean": 0.1 * jax.random.normal(k3, (64,), jnp.float32),
        "bn1_var": 0.5 + jax.random.uniform(k4, (64,), jnp.float32),
    }


def _reference(x, params, use_input_norm=True, range_norm=False):
    """Pure-JAX f32 reference mirroring the PyTorch module."""
    if range_norm:
        x = (x + 1.0) * 0.5
    if use_input_norm:
        mean = ResNet50ExtractorPallas.IMAGENET_MEAN.reshape(1, 3, 1, 1)
        std = ResNet50ExtractorPallas.IMAGENET_STD.reshape(1, 3, 1, 1)
        x = (x - mean) / std
    conv = jax.lax.conv_general_dilated(
        x, params["conv1_w"], window_strides=(2, 2), padding=[(3, 3), (3, 3)],
        dimension_numbers=("NCHW", "OIHW", "NCHW"),
        precision=jax.lax.Precision.HIGHEST,
    )
    eps = 1e-5
    scale = (params["bn1_gamma"] / jnp.sqrt(params["bn1_var"] + eps)).reshape(1, -1, 1, 1)
    shift = (params["bn1_beta"] - params["bn1_mean"]
             * params["bn1_gamma"] / jnp.sqrt(params["bn1_var"] + eps)).reshape(1, -1, 1, 1)
    relu = jnp.maximum(conv * scale + shift, 0.0)
    return {"conv1": conv, "relu": relu}


if __name__ == "__main__":
    key = jax.random.PRNGKey(0)
    kx, kp = jax.random.split(key)

    # Input tensor with shape (n, c, h, w); c must be 3 for ImageNet normalization.
    x = jax.random.uniform(kx, (2, 3, 16, 16), jnp.float32)
    params = make_params(kp)

    extractor = ResNet50ExtractorPallas(
        params, layer_labels=("conv1", "relu"),
        use_input_norm=True, range_norm=False,
    )

    out = extractor(x)
    out = jax.tree_util.tree_map(jax.block_until_ready, out)

    ref = _reference(x, params)
    for name in ("conv1", "relu"):
        assert out[name].shape == (2, 64, 8, 8), out[name].shape
        err = float(jnp.max(jnp.abs(out[name] - ref[name])))
        # Tolerance accounts for the bf16 MXU operands (f32 accumulation over K=147);
        # observed error is O(1e-3) against the pure-f32 reference.
        assert err < 2e-2, (name, err)

    print("KERNEL_OK")
</pallas_src>

<mosaic_0001>
module attributes {stable_mosaic.version = 11 : i64} {
  func.func @_affine_norm_kernel(%arg0: i32, %arg1: memref<6x256xf32, #tpu.memory_space<vmem>>, %arg2: memref<6x1xf32, #tpu.memory_space<vmem>>, %arg3: memref<6x1xf32, #tpu.memory_space<vmem>>, %arg4: memref<6x256xbf16, #tpu.memory_space<vmem>>) attributes {dimension_semantics = [#tpu.dimension_semantics<parallel>], iteration_bounds = array<i64: 1>, scalar_prefetch = 0 : i64, scratch_operands = 0 : i64, tpu.core_type = #tpu.core_type<tc>, window_params = [{transform_indices = @transform_0, window_bounds = array<i64: 6, 256>}, {pipeline_mode = #tpu.pipeline_mode<synchronous>, transform_indices = @transform_1, window_bounds = array<i64: 6, 1>}, {pipeline_mode = #tpu.pipeline_mode<synchronous>, transform_indices = @transform_2, window_bounds = array<i64: 6, 1>}, {transform_indices = @transform_3, window_bounds = array<i64: 6, 256>}]} {
    %c0 = arith.constant 0 : index
    %c0_0 = arith.constant 0 : index
    %0 = vector.load %arg1[%c0, %c0_0] : memref<6x256xf32, #tpu.memory_space<vmem>>, vector<6x256xf32>
    %c0_1 = arith.constant 0 : index
    %c0_2 = arith.constant 0 : index
    %1 = vector.load %arg2[%c0_1, %c0_2] : memref<6x1xf32, #tpu.memory_space<vmem>>, vector<6x1xf32>
    %2 = vector.broadcast %1 : vector<6x1xf32> to vector<6x256xf32>
    %3 = arith.mulf %0, %2 : vector<6x256xf32>
    %c0_3 = arith.constant 0 : index
    %c0_4 = arith.constant 0 : index
    %4 = vector.load %arg3[%c0_3, %c0_4] : memref<6x1xf32, #tpu.memory_space<vmem>>, vector<6x1xf32>
    %5 = vector.broadcast %4 : vector<6x1xf32> to vector<6x256xf32>
    %6 = arith.addf %3, %5 : vector<6x256xf32>
    %7 = arith.truncf %6 : vector<6x256xf32> to vector<6x256xbf16>
    %c0_5 = arith.constant 0 : index
    %c0_6 = arith.constant 0 : index
    %8 = vector.load %arg4[%c0_5, %c0_6] : memref<6x256xbf16, #tpu.memory_space<vmem>>, vector<6x256xbf16>
    tpu.vector_store %arg4[%c0_5, %c0_6], %7 {strides = array<i32>} : memref<6x256xbf16, #tpu.memory_space<vmem>>, vector<6x256xbf16>,
    return
  }
  func.func @transform_0(%arg0: i32) -> (i32, i32) {
    %c0_i32 = arith.constant 0 : i32
    %c0_i32_0 = arith.constant 0 : i32
    return %c0_i32, %arg0 : i32, i32
  }
  func.func @transform_1(%arg0: i32) -> (i32, i32) {
    %c0_i32 = arith.constant 0 : i32
    %c0_i32_0 = arith.constant 0 : i32
    %c0_i32_1 = arith.constant 0 : i32
    return %c0_i32, %c0_i32_0 : i32, i32
  }
  func.func @transform_2(%arg0: i32) -> (i32, i32) {
    %c0_i32 = arith.constant 0 : i32
    %c0_i32_0 = arith.constant 0 : i32
    %c0_i32_1 = arith.constant 0 : i32
    return %c0_i32, %c0_i32_0 : i32, i32
  }
  func.func @transform_3(%arg0: i32) -> (i32, i32) {
    %c0_i32 = arith.constant 0 : i32
    %c0_i32_0 = arith.constant 0 : i32
    return %c0_i32, %arg0 : i32, i32
  }
}

</mosaic_0001>

<bundles_post_ra>
// kernel: tpu_custom_call.1
= control target key start
LH: loop header
LB: loop body
LE: loop exit
PB: predicated region body
PF: predicated region fallthrough
CT: control target
= control target key end

     0   :  { %v80_v1 = vmov 0   ;;  %s117_s0 = inlined_call_operand.vmem [shape: f32[6,256], index: 0, kind: input, shape index: {}]   ;;  %s118_s1 = inlined_call_operand.vmem [shape: f32[6,1], index: 1, kind: input, shape index: {}]   ;;  %s119_s2 = inlined_call_operand.vmem [shape: f32[6,1], index: 2, kind: input, shape index: {}]   ;;  %s120_s3 = inlined_call_operand.hbm [shape: bf16[6,256], index: 3, kind: output, shape index: {}]  }
   0x1   :  { %v17_v0 = vld [vmem:[%s118_s1] sm:$0x3f]  ;;  %53 = vset.pattern.permute.xlu0 %v80_v1 }
   0x2   :  { %8 = vsyncpa [#allocation3], 0  ;;  %20 = vperm.xlu0 %53, %v17_v0   ;;  %v25_v2 = vld [vmem:[%s119_s2] sm:$0x3f]  ;;  %v16_v5 = vld [vmem:[%s117_s0 + $0x8] sm:$0x3f] }
   0x3   :  { %v15_v4 = vld [vmem:[%s117_s0] sm:$0x3f]  ;;  %s81_s1 = smov [#allocation2]   ;;  %s42_s23 = sshll.u32 %s120_s3, 4  ;;  %s43_s23 = int_to_ptr.hbm [resolvable:$true] %s42_s23 }
   0x4   :  { %s40_s20 = sshll.u32 %s81_s1, 4  ;;  %s41_s20 = int_to_ptr.vmem [resolvable:$true] %s40_s20 }
   0xa   :  { %28 = vperm.xlu0 %53, %v25_v2  }
  0x74   :  { %v21_v3 = vpop.permute.xlu0 %20 }
  0x75   :  { %v23_v6 = vmul.f32 %v21_v3, %v15_v4  ;;  %v24_v7 = vmul.f32 %v21_v3, %v16_v5 }
  0x7c   :  { %v29_v8 = vpop.permute.xlu0 %28 }
  0x7d   :  { %v31_v9 = vadd.f32 %v29_v8, %v23_v6  ;;  %v32_v10 = vadd.f32 %v29_v8, %v24_v7 }
  0x7f   :  { %v33_v11 = vpack.c.bf16 %v32_v10, %v31_v9 }
  0x81   :  { %34 = vst [vmem:[#allocation2] sm:$0x77] %v33_v11 }
  0x82   :  { %45 = dma.vmem_to_hbm [thread:$0]  %s41_s20, 128, %s43_s23, [#allocation3]  }
  0x83   :  { %78 = dma.done.wait [#allocation3], 128  }
  0x84   :  { %79 = vsyncadd [#allocation3], 4294967168 }
  0x85   :  { %50 = vsyncpa [#allocation3], 1 }

</bundles_post_ra>
